<compile_context>
chip_gen: v6e
topology: v6e:2x2x1
jax: 0.10.0
libtpu: 0.0.40
codegen_flags: <defaults>
</compile_context>

<pallas_src>
import functools

import jax
import jax.numpy as jnp
from jax.experimental import pallas as pl
from jax.experimental.pallas import tpu as pltpu

_LANE = 128
_MIB = 1 << 20

# VMEM sizing targets the smallest generation (v7x: 64 MiB physical). The scoped
# limit is raised above v5e/v6e's 16/32 MiB defaults so large weight tiles stay
# multi-buffered on every chip.
_VMEM_BUDGET = 40 * _MIB
_VMEM_LIMIT = 48 * _MIB


def _cdiv(a, b):
    return -(-a // b)


def _round_up(a, m):
    return _cdiv(a, m) * m


def _sublane_multiple(dtype):
    # 8 for f32, 16 for bf16, 32 for int8 (sublane packing).
    return max(8, 32 // jnp.dtype(dtype).itemsize)


# --------------------------------------------------------------------------- #
# Kernel
# --------------------------------------------------------------------------- #
def _fc_kernel(x_ref, w_ref, scale_ref, b_ref, o_ref, acc_ref, *,
               activation, negative_slope):
    # grid = (n, m, k); k (reduction over in_features) is last / "arbitrary".
    k = pl.program_id(2)

    @pl.when(k == 0)
    def _init():
        acc_ref[...] = jnp.zeros_like(acc_ref)

    # MXU matmul, f32 accumulation; weight arrives pre-transposed as [tk, tn].
    acc_ref[...] += jnp.dot(x_ref[...], w_ref[...],
                            preferred_element_type=jnp.float32)

    @pl.when(k == pl.num_programs(2) - 1)
    def _finalize():
        # Per-output-column affine: eval-mode BN scale applied here (a few VPU
        # ops hidden under MXU/DMA) instead of rescaling the weight in HBM.
        y = acc_ref[...] * scale_ref[...] + b_ref[...]
        if activation == "relu":
            y = jnp.maximum(y, 0.0)
        elif activation == "leaky_relu":
            if 0.0 <= negative_slope <= 1.0:
                y = jnp.maximum(y, y * negative_slope)      # cheaper than select
            else:
                y = jnp.where(y >= 0.0, y, y * negative_slope)
        elif activation is not None:
            raise NotImplementedError(
                f"{activation} activation not implemented")
        o_ref[...] = y.astype(o_ref.dtype)


# --------------------------------------------------------------------------- #
# Tiling
# --------------------------------------------------------------------------- #
def _select_nk_tiles(in_features, out_features, w_itemsize, x_itemsize):
    n128 = _round_up(out_features, _LANE)
    k128 = _round_up(in_features, _LANE)

    tn = min(1024, n128)
    # Guarantee >=2 tiles on the parallel N axis when possible so both of v7x's
    # TensorCores get work (harmless on single-TC v5e/v6e). Pick the largest
    # 128-multiple that divides n128 evenly -> no extra padding.
    if n128 // tn < 2 and n128 >= 2 * _LANE:
        best = _LANE
        t = _LANE
        while t <= n128 // 2:
            if n128 % t == 0:
                best = t
            t += _LANE
        tn = best

    tk = min(2048, k128)

    def _fits(tk_, tn_):
        vmem = (3 * tk_ * tn_ * w_itemsize        # weight tiles (up to Buffered(3))
                + 2 * 256 * tk_ * x_itemsize      # x tiles, worst-case tm = 256
                + 2 * 256 * tn_ * 4               # output tiles
                + 256 * tn_ * 4                   # f32 accumulator scratch
                + 4 * tn_ * 4)                    # bias + scale rows
        return vmem <= _VMEM_BUDGET

    while not _fits(tk, tn) and tk > _LANE:
        tk = max(_LANE, _round_up(tk // 2, _LANE))
    while not _fits(tk, tn) and tn > _LANE:
        tn = max(_LANE, _round_up(tn // 2, _LANE))

    return tn, tk, _round_up(n128, tn), _round_up(k128, tk)


# --------------------------------------------------------------------------- #
# One-time (parameter-load-time) weight preparation
# --------------------------------------------------------------------------- #
def prepare_fc_params(weight, bias=None, *, bn_params=None, bn_eps=1e-5,
                      weight_dtype=None, x_dtype=jnp.float32):
    """Fold BN (eval mode) into bias/scale, optionally cast the weight to bf16,
    transpose to [K, N] and zero-pad to tile multiples.

    Doing this once (not per forward call) removes a full extra HBM
    read+write of the weight each call -- the kernel is weight-bandwidth-bound
    for small batches."""
    out_features, in_features = weight.shape

    if bias is None:
        bias = jnp.zeros((out_features,), jnp.float32)
    bias = bias.astype(jnp.float32)

    if bn_params is not None:
        # TODO(synk): training-mode BatchNorm1d (batch statistics) is not
        # implemented; only the eval-mode affine fold is supported.
        gamma = bn_params["gamma"].astype(jnp.float32)
        beta = bn_params["beta"].astype(jnp.float32)
        mean = bn_params["running_mean"].astype(jnp.float32)
        var = bn_params["running_var"].astype(jnp.float32)
        scale = gamma * jax.lax.rsqrt(var + bn_eps)
        bias = (bias - mean) * scale + beta
    else:
        scale = jnp.ones((out_features,), jnp.float32)

    w_dtype = jnp.dtype(weight.dtype if weight_dtype is None else weight_dtype)
    # If the MXU feed is lower precision than x (e.g. bf16 weights), x is cast
    # to the same dtype at call time (halves x bytes, native bf16 MXU path).
    x_compute = w_dtype if w_dtype.itemsize < jnp.dtype(x_dtype).itemsize \
        else jnp.dtype(x_dtype)

    tn, tk, N, K = _select_nk_tiles(in_features, out_features,
                                    w_dtype.itemsize, x_compute.itemsize)

    w_t = weight.astype(w_dtype).T                          # [in, out]
    w_p = jnp.pad(w_t, ((0, K - in_features), (0, N - out_features)))
    scale_p = jnp.pad(scale, (0, N - out_features)).reshape(1, N)
    bias_p = jnp.pad(bias, (0, N - out_features)).reshape(1, N)

    return {
        "w_padded": w_p, "scale": scale_p, "bias": bias_p,
        "in_features": in_features, "out_features": out_features,
        "tn": tn, "tk": tk, "N": N, "K": K,
        "x_compute_dtype": x_compute,
    }


# --------------------------------------------------------------------------- #
# Forward wrapper
# --------------------------------------------------------------------------- #
def fully_connected(x, weight=None, bias=None, *, params=None,
                    activation="relu", negative_slope=0.01,
                    bn_params=None, bn_eps=1e-5, weight_dtype=None):
    """Forward of FullyConnectedLayer: act(Linear(x) [+ eval BatchNorm1d]).

    Preferred usage: build `params` once with prepare_fc_params() and reuse it
    (avoids re-transposing / re-padding the weight in HBM every call). Passing
    (weight [out,in], bias [out]) directly also works."""
    if params is None:
        params = prepare_fc_params(weight, bias, bn_params=bn_params,
                                   bn_eps=bn_eps, weight_dtype=weight_dtype,
                                   x_dtype=x.dtype)
    if isinstance(activation, str):
        activation = activation.lower()

    B, in_features = x.shape
    assert in_features == params["in_features"]
    out_features = params["out_features"]
    tn, tk, N, K = params["tn"], params["tk"], params["N"], params["K"]
    w_p, scale_p, bias_p = params["w_padded"], params["scale"], params["bias"]

    out_dtype = x.dtype
    xc_dtype = jnp.dtype(params["x_compute_dtype"])
    x_c = x.astype(xc_dtype) if xc_dtype.itemsize < x.dtype.itemsize else x

    # Batch tiling: first minimise the number of M tiles (each extra M tile
    # re-reads the whole weight strip from HBM), then minimise padding.
    sub = _sublane_multiple(x_c.dtype)
    m_tiles = _cdiv(B, 256)
    tm = min(256, _round_up(_cdiv(B, m_tiles), sub))
    M = m_tiles * tm

    x_p = jnp.pad(x_c, ((0, M - B), (0, K - in_features)))

    # Grid ordered (N, M, K): weight tile changes slowest across M
    # (weight-stationary for the small-B regime); K last so the accumulator
    # init/finalize pattern is valid.
    grid = (N // tn, M // tm, K // tk)

    # Triple-buffer the dominant weight stream when there is a real K pipeline.
    if K // tk >= 2:
        w_spec = pl.BlockSpec((tk, tn), lambda n, m, k: (k, n),
                              pipeline_mode=pl.Buffered(3))
    else:
        w_spec = pl.BlockSpec((tk, tn), lambda n, m, k: (k, n))

    kernel = functools.partial(_fc_kernel, activation=activation,
                               negative_slope=negative_slope)

    cost = pl.CostEstimate(
        flops=2 * M * K * N,
        bytes_accessed=(x_p.size * x_p.dtype.itemsize
                        + w_p.size * w_p.dtype.itemsize * (M // tm)
                        + M * N * jnp.dtype(out_dtype).itemsize),
        transcendentals=0)

    out = pl.pallas_call(
        kernel,
        out_shape=jax.ShapeDtypeStruct((M, N), out_dtype),
        grid_spec=pltpu.PrefetchScalarGridSpec(
            num_scalar_prefetch=0,
            grid=grid,
            in_specs=[
                pl.BlockSpec((tm, tk), lambda n, m, k: (m, k)),   # x tile
                w_spec,                                           # W^T tile
                pl.BlockSpec((1, tn), lambda n, m, k: (0, n)),    # BN scale row
                pl.BlockSpec((1, tn), lambda n, m, k: (0, n)),    # bias row
            ],
            out_specs=pl.BlockSpec((tm, tn), lambda n, m, k: (m, n)),
            scratch_shapes=[pltpu.VMEM((tm, tn), jnp.float32)],
        ),
        compiler_params=pltpu.CompilerParams(
            dimension_semantics=("parallel", "parallel", "arbitrary"),
            vmem_limit_bytes=_VMEM_LIMIT,
        ),
        cost_estimate=cost,
    )(x_p, w_p, scale_p, bias_p)

    return out[:B, :out_features]


# --------------------------------------------------------------------------- #
# Pure-JAX reference + demo
# --------------------------------------------------------------------------- #
def _reference(x, weight, bias, activation="relu", negative_slope=0.01,
               bn_params=None, bn_eps=1e-5):
    y = x @ weight.T
    if bias is not None:
        y = y + bias[None, :]
    if bn_params is not None:
        scale = bn_params["gamma"] / jnp.sqrt(bn_params["running_var"] + bn_eps)
        y = (y - bn_params["running_mean"]) * scale + bn_params["beta"]
    if activation == "relu":
        y = jnp.maximum(y, 0.0)
    elif activation == "leaky_relu":
        y = jnp.where(y >= 0.0, y, y * negative_slope)
    return y


if __name__ == "__main__":
    keys = jax.random.split(jax.random.PRNGKey(0), 12)

    # ---- 1) small FC (bn=False, bias=True), relu + leaky_relu ----
    B, fin, fout = 8, 32, 64
    x = jax.random.normal(keys[0], (B, fin), dtype=jnp.float32)
    bound = 1.0 / (fin ** 0.5)
    w = jax.random.uniform(keys[1], (fout, fin), minval=-bound, maxval=bound,
                           dtype=jnp.float32)
    b = jax.random.uniform(keys[2], (fout,), minval=-bound, maxval=bound,
                           dtype=jnp.float32)

    prm = prepare_fc_params(w, b)                 # prepared once, reused below
    out = jax.block_until_ready(fully_connected(x, params=prm, activation="relu"))
    assert out.shape == (B, fout)
    assert jnp.allclose(out, _reference(x, w, b, "relu"),
                        atol=1e-3, rtol=1e-3), "relu mismatch"

    out_l = jax.block_until_ready(
        fully_connected(x, params=prm, activation="leaky_relu"))
    assert jnp.allclose(out_l, _reference(x, w, b, "leaky_relu"),
                        atol=1e-3, rtol=1e-3), "leaky_relu mismatch"

    # ---- 2) bn=True (eval-mode BatchNorm1d) + relu ----
    bn = {
        "gamma": jax.random.uniform(keys[3], (fout,), minval=0.5, maxval=1.5),
        "beta": jax.random.normal(keys[4], (fout,)) * 0.1,
        "running_mean": jax.random.normal(keys[5], (fout,)) * 0.1,
        "running_var": jax.random.uniform(keys[6], (fout,), minval=0.5, maxval=1.5),
    }
    prm_bn = prepare_fc_params(w, b, bn_params=bn)
    out_bn = jax.block_until_ready(
        fully_connected(x, params=prm_bn, activation="relu"))
    assert jnp.allclose(out_bn, _reference(x, w, b, "relu", bn_params=bn),
                        atol=1e-3, rtol=1e-3), "bn mismatch"

    # ---- 3) odd sizes: padding on every axis + 2 N tiles (f32 path) ----
    B3, fin3, fout3 = 10, 1000, 750
    x3 = jax.random.normal(keys[7], (B3, fin3), dtype=jnp.float32)
    b3d = 1.0 / (fin3 ** 0.5)
    w3 = jax.random.uniform(keys[8], (fout3, fin3), minval=-b3d, maxval=b3d,
                            dtype=jnp.float32)
    b3 = jax.random.uniform(keys[9], (fout3,), minval=-b3d, maxval=b3d,
                            dtype=jnp.float32)
    out3 = jax.block_until_ready(fully_connected(x3, w3, b3, activation="relu"))
    assert out3.shape == (B3, fout3)
    assert jnp.allclose(out3, _reference(x3, w3, b3, "relu"),
                        atol=1e-3, rtol=1e-3), "padded-grid mismatch"

    # ---- 4) bf16 weight feed + multi-step K reduction (Buffered weight pipe) ----
    B4, fin4, fout4 = 16, 4096, 512
    x4 = jax.random.normal(keys[10], (B4, fin4), dtype=jnp.float32)
    b4d = 1.0 / (fin4 ** 0.5)
    w4 = jax.random.uniform(keys[11], (fout4, fin4), minval=-b4d, maxval=b4d,
                            dtype=jnp.float32)
    b4 = jnp.zeros((fout4,), jnp.float32)
    prm4 = prepare_fc_params(w4, b4, weight_dtype=jnp.bfloat16)
    out4 = jax.block_until_ready(
        fully_connected(x4, params=prm4, activation="relu"))
    assert out4.shape == (B4, fout4)
    assert jnp.allclose(out4, _reference(x4, w4, b4, "relu"),
                        atol=2e-2, rtol=2e-2), "bf16 mismatch"

    print("KERNEL_OK")
</pallas_src>

<mosaic_0001>
module attributes {stable_mosaic.version = 11 : i64} {
  func.func @_fc_kernel(%arg0: i32, %arg1: i32, %arg2: i32, %arg3: memref<8x128xf32, #tpu.memory_space<vmem>>, %arg4: memref<128x128xf32, #tpu.memory_space<vmem>>, %arg5: memref<1x128xf32, #tpu.memory_space<vmem>>, %arg6: memref<1x128xf32, #tpu.memory_space<vmem>>, %arg7: memref<8x128xf32, #tpu.memory_space<vmem>>, %arg8: memref<8x128xf32, #tpu.memory_space<vmem>>) attributes {dimension_semantics = [#tpu.dimension_semantics<parallel>, #tpu.dimension_semantics<parallel>, #tpu.dimension_semantics<arbitrary>], iteration_bounds = array<i64: 1, 1, 1>, scalar_prefetch = 0 : i64, scratch_operands = 1 : i64, tpu.core_type = #tpu.core_type<tc>, window_params = [{transform_indices = @transform_0, window_bounds = array<i64: 8, 128>}, {transform_indices = @transform_1, window_bounds = array<i64: 128, 128>}, {transform_indices = @transform_2, window_bounds = array<i64: 1, 128>}, {transform_indices = @transform_3, window_bounds = array<i64: 1, 128>}, {transform_indices = @transform_4, window_bounds = array<i64: 8, 128>}]} {
    %c0_i32 = arith.constant 0 : i32
    %0 = arith.cmpi eq, %arg2, %c0_i32 : i32
    %1 = arith.extui %0 : i1 to i32
    %c0_i32_0 = arith.constant 0 : i32
    %2 = arith.cmpi ne, %1, %c0_i32_0 : i32
    scf.if %2 {
      %cst_10 = arith.constant 0.000000e+00 : f32
      %12 = vector.broadcast %cst_10 : f32 to vector<8x128xf32>
      %c0_11 = arith.constant 0 : index
      %c0_12 = arith.constant 0 : index
      %13 = vector.load %arg8[%c0_11, %c0_12] : memref<8x128xf32, #tpu.memory_space<vmem>>, vector<8x128xf32>
      tpu.vector_store %arg8[%c0_11, %c0_12], %12 {strides = array<i32>} : memref<8x128xf32, #tpu.memory_space<vmem>>, vector<8x128xf32>,
    } else {
    }
    %c0 = arith.constant 0 : index
    %c0_1 = arith.constant 0 : index
    %3 = vector.load %arg8[%c0, %c0_1] : memref<8x128xf32, #tpu.memory_space<vmem>>, vector<8x128xf32>
    %c0_2 = arith.constant 0 : index
    %c0_3 = arith.constant 0 : index
    %4 = vector.load %arg3[%c0_2, %c0_3] : memref<8x128xf32, #tpu.memory_space<vmem>>, vector<8x128xf32>
    %c0_4 = arith.constant 0 : index
    %c0_5 = arith.constant 0 : index
    %5 = vector.load %arg4[%c0_4, %c0_5] : memref<128x128xf32, #tpu.memory_space<vmem>>, vector<128x128xf32>
    %cst = arith.constant dense<0.000000e+00> : vector<8x128xf32>
    %6 = tpu.matmul %4, %5, %cst {dimension_numbers = #tpu.dot_dimension_numbers<[1], [0], [0], [1], [0, 0, 1, 1], [], []>} : vector<8x128xf32>, vector<128x128xf32>, vector<8x128xf32> -> vector<8x128xf32>
    %7 = arith.addf %3, %6 : vector<8x128xf32>
    %c0_6 = arith.constant 0 : index
    %c0_7 = arith.constant 0 : index
    %8 = vector.load %arg8[%c0_6, %c0_7] : memref<8x128xf32, #tpu.memory_space<vmem>>, vector<8x128xf32>
    tpu.vector_store %arg8[%c0_6, %c0_7], %7 {strides = array<i32>} : memref<8x128xf32, #tpu.memory_space<vmem>>, vector<8x128xf32>,
    %c0_i32_8 = arith.constant 0 : i32
    %9 = arith.cmpi eq, %arg2, %c0_i32_8 : i32
    %10 = arith.extui %9 : i1 to i32
    %c0_i32_9 = arith.constant 0 : i32
    %11 = arith.cmpi ne, %10, %c0_i32_9 : i32
    scf.if %11 {
      %c0_10 = arith.constant 0 : index
      %c0_11 = arith.constant 0 : index
      %12 = vector.load %arg8[%c0_10, %c0_11] : memref<8x128xf32, #tpu.memory_space<vmem>>, vector<8x128xf32>
      %c0_12 = arith.constant 0 : index
      %c0_13 = arith.constant 0 : index
      %13 = vector.load %arg5[%c0_12, %c0_13] : memref<1x128xf32, #tpu.memory_space<vmem>>, vector<1x128xf32>
      %14 = vector.broadcast %13 : vector<1x128xf32> to vector<8x128xf32>
      %15 = arith.mulf %12, %14 : vector<8x128xf32>
      %c0_14 = arith.constant 0 : index
      %c0_15 = arith.constant 0 : index
      %16 = vector.load %arg6[%c0_14, %c0_15] : memref<1x128xf32, #tpu.memory_space<vmem>>, vector<1x128xf32>
      %17 = vector.broadcast %16 : vector<1x128xf32> to vector<8x128xf32>
      %18 = arith.addf %15, %17 : vector<8x128xf32>
      %cst_16 = arith.constant 0.000000e+00 : f32
      %19 = vector.broadcast %cst_16 : f32 to vector<8x128xf32>
      %20 = arith.maximumf %18, %19 : vector<8x128xf32>
      %c0_17 = arith.constant 0 : index
      %c0_18 = arith.constant 0 : index
      %21 = vector.load %arg7[%c0_17, %c0_18] : memref<8x128xf32, #tpu.memory_space<vmem>>, vector<8x128xf32>
      tpu.vector_store %arg7[%c0_17, %c0_18], %20 {strides = array<i32>} : memref<8x128xf32, #tpu.memory_space<vmem>>, vector<8x128xf32>,
    } else {
    }
    return
  }
  func.func @transform_0(%arg0: i32, %arg1: i32, %arg2: i32) -> (i32, i32) {
    %c0_i32 = arith.constant 0 : i32
    return %arg1, %arg2 : i32, i32
  }
  func.func @transform_1(%arg0: i32, %arg1: i32, %arg2: i32) -> (i32, i32) {
    %c0_i32 = arith.constant 0 : i32
    return %arg2, %arg0 : i32, i32
  }
  func.func @transform_2(%arg0: i32, %arg1: i32, %arg2: i32) -> (i32, i32) {
    %c0_i32 = arith.constant 0 : i32
    %c0_i32_0 = arith.constant 0 : i32
    return %c0_i32, %arg0 : i32, i32
  }
  func.func @transform_3(%arg0: i32, %arg1: i32, %arg2: i32) -> (i32, i32) {
    %c0_i32 = arith.constant 0 : i32
    %c0_i32_0 = arith.constant 0 : i32
    return %c0_i32, %arg0 : i32, i32
  }
  func.func @transform_4(%arg0: i32, %arg1: i32, %arg2: i32) -> (i32, i32) {
    %c0_i32 = arith.constant 0 : i32
    return %arg1, %arg0 : i32, i32
  }
}

</mosaic_0001>

<bundles_post_ra>
// kernel: tpu_custom_call.1
= control target key start
LH: loop header
LB: loop body
LE: loop exit
PB: predicated region body
PF: predicated region fallthrough
CT: control target
= control target key end

     0   :  { %9 = vsyncpa [#allocation4], 0  ;;  %s351_s0 = inlined_call_operand.hbm [shape: f32[8,128], index: 0, kind: input, shape index: {}]   ;;  %s352_s1 = inlined_call_operand.hbm [shape: f32[128,128], index: 1, kind: input, shape index: {}]   ;;  %s353_s2 = inlined_call_operand.vmem [shape: f32[1,128], index: 2, kind: input, shape index: {}]   ;;  %s354_s3 = inlined_call_operand.vmem [shape: f32[1,128], index: 3, kind: input, shape index: {}]   ;;  %s355_s4 = inlined_call_operand.hbm [shape: f32[8,128], index: 4, kind: output, shape index: {}]  }
   0x1   :  { %10 = vsyncpa [#allocation7], 0 }
   0x2   :  { %11 = vsyncpa [#allocation5], 0  ;;  %s304_s15 = smov [#allocation3]   ;;  %s305_s17 = smov [#allocation6]  }
   0x3   :  { %s18_s16 = sshll.u32 %s304_s15, 4  ;;  %s27_s18 = sshll.u32 %s305_s17, 4  ;;  %s19_s16 = int_to_ptr.vmem [resolvable:$true] %s18_s16  ;;  %s28_s18 = int_to_ptr.vmem [resolvable:$true] %s27_s18 }
   0x4   :  { %s246_s19 = scalar_lea.vmem %s19_s16, 128  ;;  %p251_p1 = scmp.lt.s32.totalorder %s19_s16, %s19_s16 }
   0x5   :  { %p247_p0 = scmp.ne.s32.totalorder %s19_s16, %s246_s19  ;;  %p252_p2 = scmp.lt.s32.totalorder %s246_s19, %s246_s19 }
   0x7   :  { %p253_p3 = por %p252_p2, %p251_p1 }
   0x9   :  { %p254_p4 = pnand %p253_p3, %p247_p0 }
   0xb   :  { %257 = shalt.err (!%p254_p4)
}
   0xc   :  { %21 = dma.hbm_to_vmem [thread:$0]  %s351_s0, 128, %s19_s16, [#allocation4]  }
   0xd   :  { %s266_s22 = scalar_lea.vmem %s28_s18, 2048  ;;  %p271_p6 = scmp.lt.s32.totalorder %s28_s18, %s28_s18 }
   0xe   :  { %p267_p5 = scmp.ne.s32.totalorder %s28_s18, %s266_s22  ;;  %p272_p7 = scmp.lt.s32.totalorder %s266_s22, %s266_s22 }
  0x10   :  { %p273_p8 = por %p272_p7, %p271_p6 }
  0x12   :  { %p274_p9 = pnand %p273_p8, %p267_p5 }
  0x14   :  { %277 = shalt.err (!%p274_p9)
}
  0x15   :  { %s306_s23 = smov 128   ;;  %s307_s24 = smov 8  }
  0x16   :  { %33 = dma.hbm_to_vmem [thread:$0]  %s352_s1, 2048, %s28_s18, [#allocation7], %s306_s23, %s306_s23, %s307_s24  }
  0x17   :  { %298 = dma.done.wait [#allocation4], 128  }
  0x18   :  { %299 = vsyncadd [#allocation4], 4294967168 }
  0x19   :  { %300 = dma.done.wait [#allocation7], 2048  }
  0x1a   :  { %301 = vsyncadd [#allocation7], 4294965248  ;;  %v308_v0 = vmov 0.0   ;;  %vm309_vm0 = vmmov 0   ;;  %v66_v1 = vld [vmem:[#allocation6 + $0x78] sm:$0xff]  ;;  %v65_v2 = vld [vmem:[#allocation6 + $0x70] sm:$0xff] }
  0x1b   :  { %196 = vmatprep.subr.mxu0 %v308_v0  ;;  %228 = vmatprep.mubr.msk.f32.mxu0 %vm309_vm0, %v308_v0  ;;  %v64_v3 = vld [vmem:[#allocation6 + $0x68] sm:$0xff]  ;;  %v63_v4 = vld [vmem:[#allocation6 + $0x60] sm:$0xff]  ;;  %v62_v5 = vld [vmem:[#allocation6 + $0x58] sm:$0xff]  ;;  %s310_s29 = smov [#allocation8]  }
  0x1c   :  { %197 = vmatpush3.msra.mxu0 %v66_v1  ;;  %v61_v6 = vld [vmem:[#allocation6 + $0x50] sm:$0xff]  ;;  %v60_v7 = vld [vmem:[#allocation6 + $0x48] sm:$0xff]  ;;  %v59_v8 = vld [vmem:[#allocation6 + $0x40] sm:$0xff]  ;;  %s167_s30 = sshll.u32 %s310_s29, 4  ;;  %s168_s30 = int_to_ptr.vmem [resolvable:$true] %s167_s30 }
  0x1d   :  { %198 = vmatprep.subr.mxu0 %v308_v0  ;;  %v58_v9 = vld [vmem:[#allocation6 + $0x38] sm:$0xff]  ;;  %v57_v10 = vld [vmem:[#allocation6 + $0x30] sm:$0xff]  ;;  %v56_v11 = vld [vmem:[#allocation6 + $0x28] sm:$0xff]  ;;  %s278_s5 = scalar_lea.vmem %s168_s30, 128  ;;  %p283_p11 = scmp.lt.s32.totalorder %s168_s30, %s168_s30 }
  0x1e   :  { %199 = vmatpush3.msra.mxu0 %v65_v2  ;;  %v55_v12 = vld [vmem:[#allocation6 + $0x20] sm:$0xff]  ;;  %v54_v13 = vld [vmem:[#allocation6 + $0x18] sm:$0xff]  ;;  %v53_v14 = vld [vmem:[#allocation6 + $0x10] sm:$0xff]  ;;  %p279_p10 = scmp.ne.s32.totalorder %s168_s30, %s278_s5  ;;  %p284_p12 = scmp.lt.s32.totalorder %s278_s5, %s278_s5 }
  0x1f   :  { %200 = vmatprep.subr.mxu0 %v308_v0  ;;  %v52_v15 = vld [vmem:[#allocation6 + $0x8] sm:$0xff]  ;;  %v51_v16 = vld [vmem:[#allocation6] sm:$0xff]  ;;  %v50_v17 = vld [vmem:[#allocation3] sm:$0xff] }
  0x20   :  { %201 = vmatpush3.msra.mxu0 %v64_v3  ;;  %v177_v18 = vld [vmem:[%s353_s2] ss:$0 sm:$0xff]  ;;  %p285_p13 = por %p284_p12, %p283_p11 }
  0x21   :  { %202 = vmatprep.subr.mxu0 %v308_v0  ;;  %v178_v20 = vld [vmem:[%s354_s3] ss:$0 sm:$0xff] }
  0x22   :  { %203 = vmatpush3.msra.mxu0 %v63_v4  ;;  %p286_p0 = pnand %p285_p13, %p279_p10 }
  0x23   :  { %204 = vmatprep.subr.mxu0 %v308_v0 }
  0x24   :  { %205 = vmatpush3.msra.mxu0 %v62_v5 }
  0x25   :  { %206 = vmatprep.subr.mxu0 %v308_v0 }
  0x26   :  { %207 = vmatpush3.msra.mxu0 %v61_v6 }
  0x27   :  { %208 = vmatprep.subr.mxu0 %v308_v0 }
  0x28   :  { %209 = vmatpush3.msra.mxu0 %v60_v7 }
  0x29   :  { %210 = vmatprep.subr.mxu0 %v308_v0 }
  0x2a   :  { %211 = vmatpush3.msra.mxu0 %v59_v8 }
  0x2b   :  { %212 = vmatprep.subr.mxu0 %v308_v0 }
  0x2c   :  { %213 = vmatpush3.msra.mxu0 %v58_v9 }
  0x2d   :  { %214 = vmatprep.subr.mxu0 %v308_v0 }
  0x2e   :  { %215 = vmatpush3.msra.mxu0 %v57_v10 }
  0x2f   :  { %216 = vmatprep.subr.mxu0 %v308_v0 }
  0x30   :  { %217 = vmatpush3.msra.mxu0 %v56_v11 }
  0x31   :  { %218 = vmatprep.subr.mxu0 %v308_v0 }
  0x32   :  { %219 = vmatpush3.msra.mxu0 %v55_v12 }
  0x33   :  { %220 = vmatprep.subr.mxu0 %v308_v0 }
  0x34   :  { %221 = vmatpush3.msra.mxu0 %v54_v13 }
  0x35   :  { %222 = vmatprep.subr.mxu0 %v308_v0 }
  0x36   :  { %223 = vmatpush3.msra.mxu0 %v53_v14 }
  0x37   :  { %224 = vmatprep.subr.mxu0 %v308_v0 }
  0x38   :  { %225 = vmatpush3.msra.mxu0 %v52_v15 }
  0x39   :  { %226 = vmatprep.subr.mxu0 %v308_v0 }
  0x3a   :  { %227 = vmatpush3.msra.mxu0 %v51_v16 }
  0x3b   :  { %229 = vmatmul.mubr.f32.vlgmr.msra.gmra.mxu0 %v50_v17 }
  0xfb   :  { %v133_v19 = vpop.f32.mrf.mxu0 }
  0xfc   :  { %v150_v21 = vmul.f32 %v177_v18, %v133_v19 }
  0xfd   :  { %v230_v22 = vpop.f32.mrf.mxu0 }
  0xfe   :  { %v158_v23 = vadd.f32 %v178_v20, %v150_v21 }
 0x100   :  { %v159_v24 = vmax.f32 %v158_v23, 0.0 }
 0x102   :  { %160 = vst [vmem:[#allocation8] sm:$0xff] %v159_v24 }
 0x103   :  { %289 = shalt.err (!%p286_p0)
}
 0x104   :  { %170 = dma.vmem_to_hbm [thread:$0]  %s168_s30, 128, %s355_s4, [#allocation5]  }
 0x105   :  { %302 = dma.done.wait [#allocation5], 128  }
 0x106   :  { %303 = vsyncadd [#allocation5], 4294967168 }
 0x107   :  { %174 = vsyncpa [#allocation4], 1 }
 0x108   :  { %175 = vsyncpa [#allocation7], 1 }
 0x109   :  { %176 = vsyncpa [#allocation5], 1 }

</bundles_post_ra>
